<compile_context>
chip_gen: v7x
topology: tpu7x:2x2x1
jax: 0.10.0
libtpu: 0.0.40
codegen_flags: <defaults>
</compile_context>

<pallas_src>
import functools

import jax
import jax.numpy as jnp
from jax.experimental import pallas as pl
from jax.experimental.pallas import tpu as pltpu


def _round_up(v: int, m: int) -> int:
    return ((v + m - 1) // m) * m


def _chip_config():
    """Per-generation tile / VMEM defaults (v7x has 64 MiB VMEM per TC, v5e/v6e 128 MiB)."""
    vmem_cap = 128 * 1024 * 1024
    try:
        vmem_cap = int(pltpu.get_tpu_info().vmem_capacity_bytes)
    except Exception:
        pass
    if vmem_cap <= 64 * 1024 * 1024:
        # v7x: keep tm large, narrow the weight slabs, leave headroom below physical 64 MiB.
        return dict(tm=512, tn=256, vmem_limit=56 * 1024 * 1024)
    # v5e / v6e: 128 MiB physical; big tiles to cross the weight-streaming roofline.
    return dict(tm=512, tn=512, vmem_limit=100 * 1024 * 1024)


def mlp_kernel(x_ref, wn_ref, w12_ref, w3_ref, o_ref, xn_ref, acc_ref, *, eps, tn):
    """One (token-tile, I-tile) step of RMSNorm -> silu(fc1)*fc2 -> fc3."""
    j = pl.program_id(1)

    # RMSNorm + accumulator init: once per token tile (I axis is the inner grid axis).
    @pl.when(j == 0)
    def _():
        x = x_ref[...].astype(jnp.float32)                        # (tm, H)
        mean_sq = jnp.mean(x * x, axis=-1, keepdims=True)         # (tm, 1)
        xn = wn_ref[...].astype(jnp.float32) * (x * jax.lax.rsqrt(mean_sq + eps))
        xn_ref[...] = xn.astype(xn_ref.dtype)                     # back to storage dtype
        acc_ref[...] = jnp.zeros_like(acc_ref)

    # Fused fc1|fc2 projection for this I-tile: one MXU dot, operands stay in
    # storage dtype, f32 accumulation (MXU-native path).
    xn = xn_ref[...]                                              # (tm, H)
    h12 = jnp.dot(xn, w12_ref[...], preferred_element_type=jnp.float32)  # (tm, 2*tn)
    h1 = h12[:, :tn]                                              # static 128-aligned slices
    h2 = h12[:, tn:]
    gated = h2 * h1 * jax.nn.sigmoid(h1)                          # silu fused; sigmoid -> EUP
    acc_ref[...] += jnp.dot(gated.astype(w3_ref.dtype), w3_ref[...],
                            preferred_element_type=jnp.float32)   # (tm, H)

    @pl.when(j == pl.num_programs(1) - 1)
    def _():
        o_ref[...] = acc_ref[...].astype(o_ref.dtype)


def mlp_pallas(x_tokens, w_norm, w1, w2, w3, *, eps=1e-5, tm=None, tn=None,
               vmem_limit=None):
    """x_tokens: (T, H); w_norm: (H,); w1, w2: (H, I); w3: (I, H)."""
    T, H = x_tokens.shape
    I = w1.shape[1]
    dtype = x_tokens.dtype
    dsize = jnp.dtype(dtype).itemsize
    wsize = jnp.dtype(w1.dtype).itemsize

    cfg = _chip_config()
    tm = cfg["tm"] if tm is None else tm
    tn = cfg["tn"] if tn is None else tn
    vmem_limit = cfg["vmem_limit"] if vmem_limit is None else vmem_limit

    # Clamp tiles to the problem size (16-sublane multiple covers bf16 packing; 128-lane for I).
    tm = min(tm, _round_up(T, 16))
    tn = min(tn, _round_up(I, 128))

    # Fit the double-buffered working set under the per-chip VMEM budget
    # (large-H guard, esp. v7x's 64 MiB): shrink tn first, then tm.
    def _vmem_est(tm_, tn_):
        return (2 * tm_ * H * dsize          # x tile (double buffered)
                + 2 * tm_ * H * dsize        # out tile
                + 2 * H * (2 * tn_) * wsize  # fused w1|w2 slab
                + 2 * tn_ * H * wsize        # w3 slab
                + 2 * H * wsize              # norm weight
                + tm_ * H * dsize            # xn scratch
                + tm_ * H * 4)               # f32 accumulator
    budget = int(vmem_limit * 0.85)
    while tn > 128 and _vmem_est(tm, tn) > budget:
        tn //= 2
    while tm > 64 and _vmem_est(tm, tn) > budget:
        tm = max(16, _round_up(tm // 2, 16))

    T_pad = _round_up(T, tm)
    I_pad = _round_up(I, tn)

    if T_pad != T:
        x_tokens = jnp.pad(x_tokens, ((0, T_pad - T), (0, 0)))
    if I_pad != I:
        w1 = jnp.pad(w1, ((0, 0), (0, I_pad - I)))
        w2 = jnp.pad(w2, ((0, 0), (0, I_pad - I)))
        w3 = jnp.pad(w3, ((0, I_pad - I), (0, 0)))

    # Pack fc1/fc2 into one slab, interleaved per tn-block: block j = [w1_j | w2_j].
    # (In production this packing would be done once at parameter-load time.)
    n_j = I_pad // tn
    w12 = jnp.concatenate(
        [w1.reshape(H, n_j, tn), w2.reshape(H, n_j, tn)], axis=2
    ).reshape(H, 2 * I_pad)

    grid = (T_pad // tm, n_j)

    w_bytes = (w12.size + w3.size) * wsize
    io_bytes = 2 * T * H * dsize
    cost = pl.CostEstimate(
        flops=2 * T * H * I * 3 + 6 * T * I + 5 * T * H,
        transcendentals=T * I + T,
        # Weight slabs are re-streamed once per token tile.
        bytes_accessed=grid[0] * w_bytes + io_bytes,
    )

    out = pl.pallas_call(
        functools.partial(mlp_kernel, eps=eps, tn=tn),
        out_shape=jax.ShapeDtypeStruct((T_pad, H), dtype),
        grid_spec=pltpu.PrefetchScalarGridSpec(
            num_scalar_prefetch=0,
            grid=grid,
            in_specs=[
                pl.BlockSpec((tm, H), lambda i, j: (i, 0)),        # token tile
                pl.BlockSpec((1, H), lambda i, j: (0, 0)),         # RMSNorm weight
                # TODO(synk): sweep pipeline_mode=pl.Buffered(3) on the weight slabs
                # once profiles show exposed DMA at token-tile boundaries.
                pl.BlockSpec((H, 2 * tn), lambda i, j: (0, j)),    # fused fc1|fc2 slab (in, out)
                pl.BlockSpec((tn, H), lambda i, j: (j, 0)),        # fc3 weight slab (in, out)
            ],
            out_specs=pl.BlockSpec((tm, H), lambda i, j: (i, 0)),
            scratch_shapes=[
                pltpu.VMEM((tm, H), dtype),        # normalized tokens, reused across I tiles
                pltpu.VMEM((tm, H), jnp.float32),  # f32 output accumulator
            ],
        ),
        compiler_params=pltpu.CompilerParams(
            dimension_semantics=("parallel", "arbitrary"),
            vmem_limit_bytes=vmem_limit,
        ),
        cost_estimate=cost,
    )(x_tokens, w_norm.reshape(1, H), w12, w3)

    return out[:T] if T_pad != T else out


def mlp_forward(x, params, *, eps=1e-5, tm=None, tn=None):
    """x: (B, S, H) -> (B, S, H)."""
    B, S, H = x.shape
    out = mlp_pallas(x.reshape(B * S, H),
                     params["norm_w"], params["w1"], params["w2"], params["w3"],
                     eps=eps, tm=tm, tn=tn)
    return out.reshape(B, S, H)


def mlp_reference(x, params, *, eps=1e-5):
    """Pure-JAX mirror of the PyTorch forward, for validation."""
    dtype = x.dtype
    xf = x.astype(jnp.float32)
    norm_x = jnp.mean(xf * xf, axis=-1, keepdims=True)
    x_normed = xf * jax.lax.rsqrt(norm_x + eps)
    xn = (params["norm_w"].astype(jnp.float32) * x_normed).astype(dtype)
    h1 = xn @ params["w1"]
    h2 = xn @ params["w2"]
    gated = jax.nn.silu(h1) * h2
    return gated @ params["w3"]


def init_params(key, hidden_dim, intermediate_dim, dtype=jnp.float32):
    k1, k2, k3 = jax.random.split(key, 3)
    # nn.Linear default init scale ~ U(-1/sqrt(fan_in), 1/sqrt(fan_in)).
    s1 = 1.0 / (hidden_dim ** 0.5)
    s3 = 1.0 / (intermediate_dim ** 0.5)
    return {
        "norm_w": jnp.ones((hidden_dim,), dtype=dtype),
        # stored as (in, out) == PyTorch weight.T
        "w1": jax.random.uniform(k1, (hidden_dim, intermediate_dim), dtype, -s1, s1),
        "w2": jax.random.uniform(k2, (hidden_dim, intermediate_dim), dtype, -s1, s1),
        "w3": jax.random.uniform(k3, (intermediate_dim, hidden_dim), dtype, -s3, s3),
    }


if __name__ == "__main__":
    key = jax.random.PRNGKey(0)

    # Test 1: module-sized toy shapes (B=2, S=8, H=32, I=64), f32.
    B, S, H, I = 2, 8, 32, 64
    kx, kp, key = jax.random.split(key, 3)
    x = jax.random.normal(kx, (B, S, H), dtype=jnp.float32)
    params = init_params(kp, H, I)
    out = jax.block_until_ready(mlp_forward(x, params))
    ref = mlp_reference(x, params)
    assert out.shape == (B, S, H)
    assert jnp.allclose(out, ref, atol=1e-4, rtol=1e-4), "mismatch vs reference (test 1)"

    # Test 2: lane-aligned shapes exercising the I-tiled accumulator path (2 reduction steps).
    B2, S2, H2, I2 = 2, 16, 128, 256
    kx2, kp2, key = jax.random.split(key, 3)
    x2 = jax.random.normal(kx2, (B2, S2, H2), dtype=jnp.float32)
    params2 = init_params(kp2, H2, I2)
    out2 = jax.block_until_ready(mlp_forward(x2, params2, tn=128))
    ref2 = mlp_reference(x2, params2)
    assert out2.shape == (B2, S2, H2)
    assert jnp.allclose(out2, ref2, atol=1e-4, rtol=1e-4), "mismatch vs reference (test 2)"

    # Test 3: bf16 storage path (the intended MXU-native fast path), loose tolerance.
    kx3, kp3 = jax.random.split(key)
    x3 = jax.random.normal(kx3, (B2, S2, H2), dtype=jnp.float32).astype(jnp.bfloat16)
    params3 = init_params(kp3, H2, I2, dtype=jnp.bfloat16)
    out3 = jax.block_until_ready(mlp_forward(x3, params3, tn=128))
    ref3 = mlp_reference(x3, params3)
    assert out3.shape == (B2, S2, H2)
    assert jnp.allclose(out3.astype(jnp.float32), ref3.astype(jnp.float32),
                        atol=1e-1, rtol=1e-1), "mismatch vs reference (test 3, bf16)"

    print("KERNEL_OK")
</pallas_src>

<mosaic_0001>
module attributes {stable_mosaic.version = 11 : i64} {
  func.func @mlp_kernel(%arg0: i32, %arg1: i32, %arg2: memref<16x32xf32, #tpu.memory_space<vmem>>, %arg3: memref<1x32xf32, #tpu.memory_space<vmem>>, %arg4: memref<32x256xf32, #tpu.memory_space<vmem>>, %arg5: memref<128x32xf32, #tpu.memory_space<vmem>>, %arg6: memref<16x32xf32, #tpu.memory_space<vmem>>, %arg7: memref<16x32xf32, #tpu.memory_space<vmem>>, %arg8: memref<16x32xf32, #tpu.memory_space<vmem>>) attributes {dimension_semantics = [#tpu.dimension_semantics<parallel>, #tpu.dimension_semantics<arbitrary>], iteration_bounds = array<i64: 1, 1>, scalar_prefetch = 0 : i64, scratch_operands = 2 : i64, tpu.core_type = #tpu.core_type<tc>, window_params = [{transform_indices = @transform_0, window_bounds = array<i64: 16, 32>}, {pipeline_mode = #tpu.pipeline_mode<synchronous>, transform_indices = @transform_1, window_bounds = array<i64: 1, 32>}, {transform_indices = @transform_2, window_bounds = array<i64: 32, 256>}, {transform_indices = @transform_3, window_bounds = array<i64: 128, 32>}, {transform_indices = @transform_4, window_bounds = array<i64: 16, 32>}]} {
    %c0_i32 = arith.constant 0 : i32
    %0 = arith.cmpi eq, %arg1, %c0_i32 : i32
    %1 = arith.extui %0 : i1 to i32
    %c0_i32_0 = arith.constant 0 : i32
    %2 = arith.cmpi ne, %1, %c0_i32_0 : i32
    scf.if %2 {
      %c0_14 = arith.constant 0 : index
      %c0_15 = arith.constant 0 : index
      %23 = vector.load %arg2[%c0_14, %c0_15] : memref<16x32xf32, #tpu.memory_space<vmem>>, vector<16x32xf32>
      %24 = arith.mulf %23, %23 : vector<16x32xf32>
      %cst_16 = arith.constant dense<0.000000e+00> : vector<16xf32>
      %25 = vector.multi_reduction <add>, %24, %cst_16 [1] : vector<16x32xf32> to vector<16xf32>
      %26 = vector.shape_cast %25 : vector<16xf32> to vector<16x1xf32>
      %cst_17 = arith.constant 3.200000e+01 : f32
      %27 = vector.broadcast %cst_17 : f32 to vector<16x1xf32>
      %28 = arith.divf %26, %27 : vector<16x1xf32>
      %c0_18 = arith.constant 0 : index
      %c0_19 = arith.constant 0 : index
      %29 = vector.load %arg3[%c0_18, %c0_19] : memref<1x32xf32, #tpu.memory_space<vmem>>, vector<1x32xf32>
      %cst_20 = arith.constant 9.99999974E-6 : f32
      %30 = vector.broadcast %cst_20 : f32 to vector<16x1xf32>
      %31 = arith.addf %28, %30 : vector<16x1xf32>
      %32 = math.rsqrt %31 : vector<16x1xf32>
      %33 = vector.broadcast %32 : vector<16x1xf32> to vector<16x32xf32>
      %34 = arith.mulf %23, %33 : vector<16x32xf32>
      %35 = vector.broadcast %29 : vector<1x32xf32> to vector<16x32xf32>
      %36 = arith.mulf %35, %34 : vector<16x32xf32>
      %c0_21 = arith.constant 0 : index
      %c0_22 = arith.constant 0 : index
      %37 = vector.load %arg7[%c0_21, %c0_22] : memref<16x32xf32, #tpu.memory_space<vmem>>, vector<16x32xf32>
      tpu.vector_store %arg7[%c0_21, %c0_22], %36 {strides = array<i32>} : memref<16x32xf32, #tpu.memory_space<vmem>>, vector<16x32xf32>,
      %cst_23 = arith.constant 0.000000e+00 : f32
      %38 = vector.broadcast %cst_23 : f32 to vector<16x32xf32>
      %c0_24 = arith.constant 0 : index
      %c0_25 = arith.constant 0 : index
      %39 = vector.load %arg8[%c0_24, %c0_25] : memref<16x32xf32, #tpu.memory_space<vmem>>, vector<16x32xf32>
      tpu.vector_store %arg8[%c0_24, %c0_25], %38 {strides = array<i32>} : memref<16x32xf32, #tpu.memory_space<vmem>>, vector<16x32xf32>,
    } else {
    }
    %c0 = arith.constant 0 : index
    %c0_1 = arith.constant 0 : index
    %3 = vector.load %arg7[%c0, %c0_1] : memref<16x32xf32, #tpu.memory_space<vmem>>, vector<16x32xf32>
    %c0_2 = arith.constant 0 : index
    %c0_3 = arith.constant 0 : index
    %4 = vector.load %arg4[%c0_2, %c0_3] : memref<32x256xf32, #tpu.memory_space<vmem>>, vector<32x256xf32>
    %cst = arith.constant dense<0.000000e+00> : vector<16x256xf32>
    %5 = tpu.matmul %3, %4, %cst {dimension_numbers = #tpu.dot_dimension_numbers<[1], [0], [0], [1], [0, 0, 1, 1], [], []>} : vector<16x32xf32>, vector<32x256xf32>, vector<16x256xf32> -> vector<16x256xf32>
    %6 = vector.extract_strided_slice %5 {offsets = [0, 0], sizes = [16, 128], strides = [1, 1]} : vector<16x256xf32> to vector<16x128xf32>
    %7 = vector.extract_strided_slice %5 {offsets = [0, 128], sizes = [16, 128], strides = [1, 1]} : vector<16x256xf32> to vector<16x128xf32>
    %8 = arith.mulf %7, %6 : vector<16x128xf32>
    %9 = arith.negf %6 : vector<16x128xf32>
    %10 = math.exp %9 : vector<16x128xf32>
    %cst_4 = arith.constant 1.000000e+00 : f32
    %11 = vector.broadcast %cst_4 : f32 to vector<16x128xf32>
    %12 = arith.addf %11, %10 : vector<16x128xf32>
    %13 = arith.divf %11, %12 : vector<16x128xf32>
    %14 = arith.mulf %8, %13 : vector<16x128xf32>
    %c0_5 = arith.constant 0 : index
    %c0_6 = arith.constant 0 : index
    %15 = vector.load %arg8[%c0_5, %c0_6] : memref<16x32xf32, #tpu.memory_space<vmem>>, vector<16x32xf32>
    %c0_7 = arith.constant 0 : index
    %c0_8 = arith.constant 0 : index
    %16 = vector.load %arg5[%c0_7, %c0_8] : memref<128x32xf32, #tpu.memory_space<vmem>>, vector<128x32xf32>
    %cst_9 = arith.constant dense<0.000000e+00> : vector<16x32xf32>
    %17 = tpu.matmul %14, %16, %cst_9 {dimension_numbers = #tpu.dot_dimension_numbers<[1], [0], [0], [1], [0, 0, 1, 1], [], []>} : vector<16x128xf32>, vector<128x32xf32>, vector<16x32xf32> -> vector<16x32xf32>
    %18 = arith.addf %15, %17 : vector<16x32xf32>
    %c0_10 = arith.constant 0 : index
    %c0_11 = arith.constant 0 : index
    %19 = vector.load %arg8[%c0_10, %c0_11] : memref<16x32xf32, #tpu.memory_space<vmem>>, vector<16x32xf32>
    tpu.vector_store %arg8[%c0_10, %c0_11], %18 {strides = array<i32>} : memref<16x32xf32, #tpu.memory_space<vmem>>, vector<16x32xf32>,
    %c0_i32_12 = arith.constant 0 : i32
    %20 = arith.cmpi eq, %arg1, %c0_i32_12 : i32
    %21 = arith.extui %20 : i1 to i32
    %c0_i32_13 = arith.constant 0 : i32
    %22 = arith.cmpi ne, %21, %c0_i32_13 : i32
    scf.if %22 {
      %c0_14 = arith.constant 0 : index
      %c0_15 = arith.constant 0 : index
      %23 = vector.load %arg8[%c0_14, %c0_15] : memref<16x32xf32, #tpu.memory_space<vmem>>, vector<16x32xf32>
      %c0_16 = arith.constant 0 : index
      %c0_17 = arith.constant 0 : index
      %24 = vector.load %arg6[%c0_16, %c0_17] : memref<16x32xf32, #tpu.memory_space<vmem>>, vector<16x32xf32>
      tpu.vector_store %arg6[%c0_16, %c0_17], %23 {strides = array<i32>} : memref<16x32xf32, #tpu.memory_space<vmem>>, vector<16x32xf32>,
    } else {
    }
    return
  }
  func.func @transform_0(%arg0: i32, %arg1: i32) -> (i32, i32) {
    %c0_i32 = arith.constant 0 : i32
    %c0_i32_0 = arith.constant 0 : i32
    return %arg0, %c0_i32 : i32, i32
  }
  func.func @transform_1(%arg0: i32, %arg1: i32) -> (i32, i32) {
    %c0_i32 = arith.constant 0 : i32
    %c0_i32_0 = arith.constant 0 : i32
    %c0_i32_1 = arith.constant 0 : i32
    return %c0_i32, %c0_i32_0 : i32, i32
  }
  func.func @transform_2(%arg0: i32, %arg1: i32) -> (i32, i32) {
    %c0_i32 = arith.constant 0 : i32
    %c0_i32_0 = arith.constant 0 : i32
    return %c0_i32, %arg1 : i32, i32
  }
  func.func @transform_3(%arg0: i32, %arg1: i32) -> (i32, i32) {
    %c0_i32 = arith.constant 0 : i32
    %c0_i32_0 = arith.constant 0 : i32
    return %arg1, %c0_i32 : i32, i32
  }
  func.func @transform_4(%arg0: i32, %arg1: i32) -> (i32, i32) {
    %c0_i32 = arith.constant 0 : i32
    %c0_i32_0 = arith.constant 0 : i32
    return %arg0, %c0_i32 : i32, i32
  }
}

</mosaic_0001>

<bundles_post_ra>
// kernel: tpu_custom_call.1
= control target key start
LH: loop header
LB: loop body
LE: loop exit
PB: predicated region body
PF: predicated region fallthrough
CT: control target
= control target key end

     0   :  { %9 = vsyncpa [#allocation5], 0  ;;  %s702_s0 = inlined_call_operand.hbm [shape: f32[16,32], index: 0, kind: input, shape index: {}]   ;;  %s703_s1 = inlined_call_operand.hbm [shape: f32[1,32], index: 1, kind: input, shape index: {}]   ;;  %s704_s2 = inlined_call_operand.hbm [shape: f32[32,256], index: 2, kind: input, shape index: {}]   ;;  %s705_s3 = inlined_call_operand.hbm [shape: f32[128,32], index: 3, kind: input, shape index: {}]   ;;  %s706_s4 = inlined_call_operand.hbm [shape: f32[16,32], index: 4, kind: output, shape index: {}]  }
   0x1   :  { %10 = vsyncpa [#allocation8], 0 }
   0x2   :  { %11 = vsyncpa [#allocation11], 0 }
   0x3   :  { %12 = vsyncpa [#allocation6], 0  ;;  %s579_s15 = smov [#allocation7]   ;;  %s580_s17 = smov [#allocation4]  }
   0x4   :  { %s31_s16 = sshll.u32 %s579_s15, 4  ;;  %s18_s18 = sshll.u32 %s580_s17, 4  ;;  %s32_s16 = int_to_ptr.vmem [resolvable:$true] %s31_s16  ;;  %s614_s18 = int_to_ptr.vmem [resolvable:$true] %s18_s18 }
   0x5   :  { %s461_s21 = scalar_lea.hbm %s703_s1, 16 }
   0x6   :  { %p462_p0 = scmp.ne.s32.totalorder %s703_s1, %s461_s21  ;;  %p465_p1 = scmp.lt.u32.totalorder %s461_s21, %s703_s1 }
   0x8   :  { %p467_p2 = pnand %p465_p1, %p462_p0 }
   0xa   :  { %470 = shalt.err (!%p467_p2)
}
   0xb   :  { %s471_s26 = scalar_lea.vmem %s32_s16, 16  ;;  %s475_s27 = scalar_lea.vmem %s32_s16, 32 }
   0xc   :  { %p472_p3 = scmp.ne.s32.totalorder %s32_s16, %s471_s26  ;;  %p476_p4 = scmp.lt.s32.totalorder %s32_s16, %s32_s16 }
   0xd   :  { %p477_p5 = scmp.lt.s32.totalorder %s475_s27, %s471_s26 }
   0xf   :  { %p478_p6 = por %p477_p5, %p476_p4 }
  0x11   :  { %p479_p7 = pnand %p478_p6, %p472_p3 }
  0x13   :  { %482 = shalt.err (!%p479_p7)
}
  0x14   :  { %34 = dma.hbm_to_vmem [thread:$0]  %s703_s1, 16, %s32_s16, [#allocation8]  }
  0x15   :  { %s483_s6 = scalar_lea.hbm %s702_s0, 256 }
  0x16   :  { %p484_p8 = scmp.ne.s32.totalorder %s702_s0, %s483_s6  ;;  %p487_p9 = scmp.lt.u32.totalorder %s483_s6, %s702_s0 }
  0x18   :  { %p489_p10 = pnand %p487_p9, %p484_p8 }
  0x1a   :  { %492 = shalt.err (!%p489_p10)
}
  0x1b   :  { %s493_s11 = scalar_lea.vmem %s614_s18, 256  ;;  %p498_p12 = scmp.lt.s32.totalorder %s614_s18, %s614_s18 }
  0x1c   :  { %p494_p11 = scmp.ne.s32.totalorder %s614_s18, %s493_s11  ;;  %p499_p13 = scmp.lt.s32.totalorder %s493_s11, %s493_s11 }
  0x1e   :  { %p500_p0 = por %p499_p13, %p498_p12 }
  0x20   :  { %p501_p1 = pnand %p500_p0, %p494_p11 }
  0x22   :  { %504 = shalt.err (!%p501_p1)
}
  0x23   :  { %s581_s1 = smov 128   ;;  %s582_s12 = smov 8  }
  0x24   :  { %24 = dma.hbm_to_vmem [thread:$0]  %s702_s0, 256, %s614_s18, [#allocation5], %s581_s1, %s581_s1, %s582_s12  }
  0x25   :  { %s583_s15 = smov [#allocation9]   ;;  %s505_s20 = scalar_lea.hbm %s704_s2, 1024 }
  0x26   :  { %s40_s16 = sshll.u32 %s583_s15, 4  ;;  %p506_p2 = scmp.ne.s32.totalorder %s704_s2, %s505_s20  ;;  %s41_s16 = int_to_ptr.vmem [resolvable:$true] %s40_s16 }
  0x27   :  { %p509_p3 = scmp.lt.u32.totalorder %s505_s20, %s704_s2 }
  0x29   :  { %p511_p4 = pnand %p509_p3, %p506_p2 }
  0x2b   :  { %514 = shalt.err (!%p511_p4)
}
  0x2c   :  { %s515_s25 = scalar_lea.vmem %s41_s16, 1024  ;;  %p520_p6 = scmp.lt.s32.totalorder %s41_s16, %s41_s16 }
  0x2d   :  { %p516_p5 = scmp.ne.s32.totalorder %s41_s16, %s515_s25  ;;  %p521_p7 = scmp.lt.s32.totalorder %s515_s25, %s515_s25 }
  0x2f   :  { %p522_p8 = por %p521_p7, %p520_p6 }
  0x31   :  { %p523_p9 = pnand %p522_p8, %p516_p5 }
  0x33   :  { %526 = shalt.err (!%p523_p9)
}
  0x34   :  { %s584_s0 = smov 256   ;;  %s585_s18 = smov 16  }
  0x35   :  { %46 = dma.hbm_to_vmem [thread:$0]  %s704_s2, 1024, %s41_s16, [#allocation8], %s584_s0, %s584_s0, %s585_s18  }
  0x36   :  { %s586_s28 = smov [#allocation10]   ;;  %s527_s6 = scalar_lea.hbm %s705_s3, 2048 }
  0x37   :  { %s52_s29 = sshll.u32 %s586_s28, 4  ;;  %p528_p10 = scmp.ne.s32.totalorder %s705_s3, %s527_s6  ;;  %s53_s29 = int_to_ptr.vmem [resolvable:$true] %s52_s29 }
  0x38   :  { %p531_p11 = scmp.lt.u32.totalorder %s527_s6, %s705_s3 }
  0x3a   :  { %p533_p12 = pnand %p531_p11, %p528_p10 }
  0x3c   :  { %536 = shalt.err (!%p533_p12)
}
  0x3d   :  { %s537_s11 = scalar_lea.vmem %s53_s29, 2048  ;;  %p542_p0 = scmp.lt.s32.totalorder %s53_s29, %s53_s29 }
  0x3e   :  { %p538_p13 = scmp.ne.s32.totalorder %s53_s29, %s537_s11  ;;  %p543_p1 = scmp.lt.s32.totalorder %s537_s11, %s537_s11 }
  0x40   :  { %p544_p2 = por %p543_p1, %p542_p0 }
  0x42   :  { %p545_p3 = pnand %p544_p2, %p538_p13 }
  0x44   :  { %548 = shalt.err (!%p545_p3)
}
  0x45   :  { %58 = dma.hbm_to_vmem [thread:$0]  %s705_s3, 2048, %s53_s29, [#allocation11], %s581_s1, %s581_s1, %s582_s12  }
  0x46   :  { %571 = dma.done.wait [#allocation5], 256  }
  0x47   :  { %572 = vsyncadd [#allocation5], 4294967040 }
  0x48   :  { %573 = dma.done.wait [#allocation8], 1040  }
  0x49   :  { %574 = vsyncadd [#allocation8], 4294966256 }
  0x4a   :  { %575 = dma.done.wait [#allocation11], 2048  }
  0x4b   :  { %576 = vsyncadd [#allocation11], 4294965248  ;;  %v75_v0 = vld [vmem:[#allocation4] sm:$0xff]  ;;  %vm79_vm0 = vcmask 261120   ;;  %v76_v1 = vld [vmem:[#allocation4 + $0x8] sm:$0xff]  ;;  %v587_v18 = vmov 0.0  }
  0x4c   :  { %v77_v2 = vmul.f32 %v75_v0, %v75_v0  ;;  %v78_v3 = vmul.f32 %v76_v1, %v76_v1  ;;  %v111_v6 = vld [vmem:[#allocation9 + $0x8] sm:$0xff]  ;;  %v113_v7 = vld [vmem:[#allocation9 + $0x18] sm:$0xff]  ;;  %v110_v9 = vld [vmem:[#allocation9] sm:$0xff]  ;;  %106 = vst.msk [vmem:[#allocation3] sm:$0xff] %vm79_vm0, %v587_v18  ;;  %189 = vmatprep.mubr.f32.mxu0 %v587_v18  ;;  %s588_s3 = smov [#allocation12]  }
  0x4d   :  { %v399_v8 = vpack.c.bf16 %v113_v7, %v111_v6  ;;  %v112_v10 = vld [vmem:[#allocation9 + $0x10] sm:$0xff]  ;;  %v115_v12 = vld [vmem:[#allocation9 + $0x28] sm:$0xff]  ;;  %v117_v13 = vld [vmem:[#allocation9 + $0x38] sm:$0xff]  ;;  %107 = vst.msk [vmem:[#allocation3 + $0x8] sm:$0xff] %vm79_vm0, %v587_v18  ;;  %s327_s14 = sshll.u32 %s588_s3, 4  ;;  %s328_s14 = int_to_ptr.vmem [resolvable:$true] %s327_s14 }
  0x4e   :  { %v80_v4 = vsel %vm79_vm0, %v77_v2, 0.0  ;;  %v83_v5 = vsel %vm79_vm0, %v78_v3, 0.0  ;;  %v401_v11 = vpack.c.bf16 %v112_v10, %v110_v9  ;;  %v403_v14 = vpack.c.bf16 %v117_v13, %v115_v12  ;;  %v114_v15 = vld [vmem:[#allocation9 + $0x20] sm:$0xff]  ;;  %v116_v16 = vld [vmem:[#allocation9 + $0x30] sm:$0xff]  ;;  %v341_v26 = vld [vmem:[#allocation7] ss:$0 sm:$0xff]  ;;  %p554_p5 = scmp.lt.s32.totalorder %s328_s14, %s328_s14 }
  0x4f   :  { %81 = vadd.xlane.f32.xlu0 %v80_v4  ;;  %400 = vmatprep.subr.bf16.mxu0 %v399_v8  ;;  %v405_v17 = vpack.c.bf16 %v116_v16, %v114_v15  ;;  %v220_v34 = vld [vmem:[#allocation10] sm:$0xff]  ;;  %v221_v35 = vld [vmem:[#allocation10 + $0x8] sm:$0xff]  ;;  %v222_v37 = vld [vmem:[#allocation10 + $0x10] sm:$0xff]  ;;  %s549_s15 = scalar_lea.vmem %s328_s14, 256 }
  0x50   :  { %402 = vmatpush1.bf16.msra.mxu0 %v401_v11  ;;  %v407_v36 = vpack.c.bf16 %v221_v35, %v220_v34  ;;  %v223_v38 = vld [vmem:[#allocation10 + $0x18] sm:$0xff]  ;;  %v224_v40 = vld [vmem:[#allocation10 + $0x20] sm:$0xff]  ;;  %v225_v41 = vld [vmem:[#allocation10 + $0x28] sm:$0xff]  ;;  %p550_p4 = scmp.ne.s32.totalorder %s328_s14, %s549_s15  ;;  %p555_p6 = scmp.lt.s32.totalorder %s549_s15, %s549_s15 }
  0x51   :  { %404 = vmatprep.subr.bf16.mxu0 %v403_v14  ;;  %v411_v39 = vpack.c.bf16 %v223_v38, %v222_v37  ;;  %v415_v42 = vpack.c.bf16 %v225_v41, %v224_v40  ;;  %v226_v43 = vld [vmem:[#allocation10 + $0x30] sm:$0xff]  ;;  %v227_v44 = vld [vmem:[#allocation10 + $0x38] sm:$0xff]  ;;  %v228_v46 = vld [vmem:[#allocation10 + $0x40] sm:$0xff] }
  0x52   :  { %408 = vmatprep.subr.bf16.mxu1 %v407_v36  ;;  %v419_v45 = vpack.c.bf16 %v227_v44, %v226_v43  ;;  %v229_v47 = vld [vmem:[#allocation10 + $0x48] sm:$0xff]  ;;  %v230_v49 = vld [vmem:[#allocation10 + $0x50] sm:$0xff]  ;;  %v231_v50 = vld [vmem:[#allocation10 + $0x58] sm:$0xff]  ;;  %p556_p7 = por %p555_p6, %p554_p5 }
  0x53   :  { %84 = vadd.xlane.f32.xlu0 %v83_v5  ;;  %410 = vmatpush3.bf16.msra.mxu1 %v407_v36  ;;  %v423_v48 = vpack.c.bf16 %v229_v47, %v228_v46  ;;  %v427_v51 = vpack.c.bf16 %v231_v50, %v230_v49  ;;  %v232_v52 = vld [vmem:[#allocation10 + $0x60] sm:$0xff]  ;;  %v233_v53 = vld [vmem:[#allocation10 + $0x68] sm:$0xff]  ;;  %v234_v55 = vld [vmem:[#allocation10 + $0x70] sm:$0xff] }
  0x54   :  { %406 = vmatpush1.bf16.msra.mxu0 %v405_v17  ;;  %412 = vmatprep.subr.bf16.mxu1 %v411_v39  ;;  %v431_v54 = vpack.c.bf16 %v233_v53, %v232_v52  ;;  %v235_v56 = vld [vmem:[#allocation10 + $0x78] sm:$0xff]  ;;  %v219_v10 = vld [vmem:[#allocation3 + $0x8] sm:$0xff]  ;;  %p557_p8 = pnand %p556_p7, %p550_p4 }
  0x55   :  { %v435_v57 = vpack.c.bf16 %v235_v56, %v234_v55  ;;  %v218_v11 = vld [vmem:[#allocation3] sm:$0xff] }
  0x57   :  { %414 = vmatpush3.bf16.msra.mxu1 %v411_v39 }
  0x58   :  { %416 = vmatprep.subr.bf16.mxu1 %v415_v42 }
  0x5b   :  { %418 = vmatpush3.bf16.msra.mxu1 %v415_v42 }
  0x5c   :  { %420 = vmatprep.subr.bf16.mxu1 %v419_v45 }
  0x5f   :  { %422 = vmatpush3.bf16.msra.mxu1 %v419_v45 }
  0x60   :  { %424 = vmatprep.subr.bf16.mxu1 %v423_v48 }
  0x63   :  { %426 = vmatpush3.bf16.msra.mxu1 %v423_v48 }
  0x64   :  { %428 = vmatprep.subr.bf16.mxu1 %v427_v51 }
  0x67   :  { %430 = vmatpush3.bf16.msra.mxu1 %v427_v51 }
  0x68   :  { %432 = vmatprep.subr.bf16.mxu1 %v431_v54 }
  0x6b   :  { %434 = vmatpush3.bf16.msra.mxu1 %v431_v54 }
  0x6c   :  { %436 = vmatprep.subr.bf16.mxu1 %v435_v57 }
  0x6f   :  { %438 = vmatpush3.bf16.msra.mxu1 %v435_v57 }
  0xdc   :  { %v82_v19 = vpop.xlane.xlu0 %81 }
  0xdd   :  { %v87_v20 = vmul.f32 0.03125, %v82_v19 }
  0xdf   :  { %v90_v21 = vadd.f32 1e-05, %v87_v20 }
  0xe0   :  { %v85_v22 = vpop.xlane.xlu0 %84 }
  0xe1   :  { %449 = vrsqrt.f32 %v90_v21  ;;  %v88_v23 = vmul.f32 0.03125, %v85_v22 }
  0xe3   :  { %v91_v24 = vadd.f32 1e-05, %v88_v23 }
  0xe5   :  { %451 = vrsqrt.f32 %v91_v24 }
  0xeb   :  { %v450_v25 = vpop.eup %449 }
  0xec   :  { %v94_v27 = vmul.f32 %v450_v25, %v75_v0 }
  0xee   :  { %v102_v28 = vmul.f32 %v341_v26, %v94_v27 }
  0xef   :  { %v452_v29 = vpop.eup %451 }
  0xf0   :  { %104 = vst.msk [vmem:[#allocation2] sm:$0xff] %vm79_vm0, %v102_v28  ;;  %v95_v30 = vmul.f32 %v452_v29, %v76_v1 }
  0xf2   :  { %v103_v31 = vmul.f32 %v341_v26, %v95_v30 }
  0xf4   :  { %105 = vst.msk [vmem:[#allocation2 + $0x8] sm:$0xff] %vm79_vm0, %v103_v31 }
  0xf7   :  { %v108_v32 = vld [vmem:[#allocation2] sm:$0xff] }
  0xf8   :  { %342 = vmatmul.mubr.msk.f32.vlgmr.msra.gmra.mrb[0].mxu0 %vm79_vm0, %v108_v32 }
  0xf9   :  { %195 = vmatprep.mubr.f32.mxu0 %v587_v18 }
  0xfb   :  { %v109_v33 = vld [vmem:[#allocation2 + $0x8] sm:$0xff] }
  0xfc   :  { %343 = vmatmul.mubr.msk.f32.gmra.mrb[2].mxu0 %vm79_vm0, %v109_v33 }
 0x1cb   :  { %v191_v58 = vpop.f32.mrb[0].mxu0 }
 0x1cc   :  { %v344_v59 = vmul.f32 -1.442695, %v191_v58  ;;  %v193_v60 = vpop.f32.mrb[1].mxu0 }
 0x1cd   :  { %v202_v61 = vmul.f32 %v193_v60, %v191_v58 }
 0x1ce   :  { %453 = vpow2.f32 %v344_v59 }
 0x1cf   :  { %v197_v62 = vpop.f32.mrb[2].mxu0 }
 0x1d0   :  { %v345_v63 = vmul.f32 -1.442695, %v197_v62  ;;  %v199_v0 = vpop.f32.mrb[3].mxu0 }
 0x1d1   :  { %v203_v1 = vmul.f32 %v199_v0, %v197_v62 }
 0x1d2   :  { %455 = vpow2.f32 %v345_v63 }
 0x1d8   :  { %v454_v2 = vpop.eup %453 }
 0x1d9   :  { %v210_v3 = vadd.f32 1.0, %v454_v2 }
 0x1db   :  { %457 = vrcp.f32 %v210_v3 }
 0x1dc   :  { %v456_v4 = vpop.eup %455 }
 0x1dd   :  { %v211_v5 = vadd.f32 1.0, %v456_v4 }
 0x1df   :  { %459 = vrcp.f32 %v211_v5 }
 0x1e5   :  { %v458_v6 = vpop.eup %457 }
 0x1e6   :  { %v216_v7 = vmul.f32 %v458_v6, %v202_v61 }
 0x1e8   :  { %396 = vmatprep.mubr.f32.mxu1 %v216_v7 }
 0x1e9   :  { %v460_v8 = vpop.eup %459 }
 0x1ea   :  { %v217_v9 = vmul.f32 %v460_v8, %v203_v1 }
 0x1ec   :  { %397 = vmatmul.mubr.f32.vlgmr.msra.gmra.mrb[0].mxu1 %v217_v9 }
 0x2bf   :  { %v398_v12 = vpop.f32.mrb[0].mxu1 }
 0x2c0   :  { %v312_v13 = vadd.f32 %v398_v12, %v219_v10  ;;  %v302_v14 = vpop.f32.mrb[1].mxu1 }
 0x2c1   :  { %v311_v15 = vadd.f32 %v302_v14, %v218_v11 }
 0x2c2   :  { %314 = vst.msk [vmem:[#allocation3 + $0x8] sm:$0xff] %vm79_vm0, %v312_v13 }
 0x2c3   :  { %313 = vst.msk [vmem:[#allocation3] sm:$0xff] %vm79_vm0, %v311_v15 }
 0x2c9   :  { %v319_v16 = vld [vmem:[#allocation3 + $0x8] sm:$0xff] }
 0x2ca   :  { %v318_v17 = vld [vmem:[#allocation3] sm:$0xff]  ;;  %321 = vst.msk [vmem:[#allocation12 + $0x8] sm:$0xff] %vm79_vm0, %v319_v16 }
 0x2cb   :  { %320 = vst.msk [vmem:[#allocation12] sm:$0xff] %vm79_vm0, %v318_v17 }
 0x2cc   :  { %560 = shalt.err (!%p557_p8)
}
 0x2cd   :  { %s561_s19 = scalar_lea.hbm %s706_s4, 256 }
 0x2ce   :  { %p562_p9 = scmp.ne.s32.totalorder %s706_s4, %s561_s19  ;;  %p565_p10 = scmp.lt.u32.totalorder %s561_s19, %s706_s4 }
 0x2d0   :  { %p567_p11 = pnand %p565_p10, %p562_p9 }
 0x2d2   :  { %570 = shalt.err (!%p567_p11)
}
 0x2d3   :  { %333 = dma.vmem_to_hbm [thread:$0]  %s328_s14, 256, %s706_s4, [#allocation6], %s581_s1, %s581_s1, %s582_s12  }
 0x2d4   :  { %577 = dma.done.wait [#allocation6], 256  }
 0x2d5   :  { %578 = vsyncadd [#allocation6], 4294967040 }
 0x2d6   :  { %337 = vsyncpa [#allocation5], 1 }
 0x2d7   :  { %338 = vsyncpa [#allocation8], 1 }
 0x2d8   :  { %339 = vsyncpa [#allocation11], 1 }
 0x2d9   :  { %340 = vsyncpa [#allocation6], 1 }

</bundles_post_ra>
